<compile_context>
chip_gen: v7x
topology: tpu7x:2x2x1
jax: 0.10.0
libtpu: 0.0.40
codegen_flags: <defaults>
</compile_context>

<pallas_src>
import functools

import jax
import jax.numpy as jnp
from jax import lax
from jax.experimental import pallas as pl
from jax.experimental.pallas import tpu as pltpu

_LANES = 128


def _dice_sums_kernel(logits_ref, targets_ref,
                      inter_out, psum_out, tsum_out,
                      inter_acc, psum_acc, tsum_acc,
                      *, n_valid, need_mask):
    """Accumulate lane-wise partial sums over feature tiles of one chunk."""
    p = pl.program_id(0)          # parallel chunk (v7x: one per TensorCore)
    g = pl.program_id(1)          # reduction step within chunk
    num_g = pl.num_programs(1)

    @pl.when(g == 0)
    def _():
        inter_acc[...] = jnp.zeros_like(inter_acc)
        psum_acc[...] = jnp.zeros_like(psum_acc)
        tsum_acc[...] = jnp.zeros_like(tsum_acc)

    probs = jax.nn.sigmoid(logits_ref[...].astype(jnp.float32))
    tgt = targets_ref[...].astype(jnp.float32)

    if need_mask:
        # Zero out logical positions >= N: covers a non-lane-aligned tail,
        # a partial last row block, and duplicate (clamped) blocks.
        r_blk = logits_ref.shape[1]
        row0 = (p * num_g + g) * r_blk
        row_idx = lax.broadcasted_iota(jnp.int32, probs.shape, 1)
        lane_idx = lax.broadcasted_iota(jnp.int32, probs.shape, 2)
        valid = (row0 + row_idx) * _LANES + lane_idx < n_valid
        probs = jnp.where(valid, probs, 0.0)
        tgt = jnp.where(valid, tgt, 0.0)

    # Per-tile reduce over the row (sublane) axis only; cross-lane reduce is
    # deferred to the epilogue in the wrapper.
    inter_acc[...] += jnp.sum(probs * tgt, axis=1)
    psum_acc[...] += jnp.sum(probs, axis=1)
    tsum_acc[...] += jnp.sum(tgt, axis=1)

    @pl.when(g == num_g - 1)
    def _():
        inter_out[0] = inter_acc[...]
        psum_out[0] = psum_acc[...]
        tsum_out[0] = tsum_acc[...]


def dice_loss(logits, targets, smooth=1.0, *, num_chunks=2,
              target_tile_bytes=2 * 1024 * 1024):
    """Pallas implementation of DiceLoss.forward (returns a scalar)."""
    B = logits.shape[0]
    logits2d = logits.reshape(B, -1)
    targets2d = targets.reshape(B, -1)
    N = logits2d.shape[1]

    # Lane-align the feature axis so (B, N) -> (B, R, 128) is a free reshape.
    # Pads only when N % 128 != 0 (at most 127 columns); pad values are
    # irrelevant because the kernel masks the tail.
    R_total = pl.cdiv(N, _LANES)
    pad_cols = R_total * _LANES - N
    if pad_cols:
        logits2d = jnp.pad(logits2d, ((0, 0), (0, pad_cols)))
        targets2d = jnp.pad(targets2d, ((0, 0), (0, pad_cols)))
    logits3d = logits2d.reshape(B, R_total, _LANES)
    targets3d = targets2d.reshape(B, R_total, _LANES)

    # Row-tile size: ~target_tile_bytes per input per pipeline buffer (big
    # streaming tiles -> ~86% of HBM roofline), rows a multiple of 8 to match
    # the (8,128) sublane/lane tiling.
    bytes_per_row = B * _LANES * max(logits3d.dtype.itemsize,
                                     targets3d.dtype.itemsize)
    r_blk = (target_tile_bytes // max(bytes_per_row, 1)) // 8 * 8
    r_blk = max(8, min(r_blk, 2048))
    if r_blk >= R_total:
        r_blk = R_total               # whole feature axis in one block

    n_tiles = pl.cdiv(R_total, r_blk)
    P = min(num_chunks, n_tiles)      # parallel chunks (fills both TCs on v7x)
    G = pl.cdiv(n_tiles, P)           # reduction steps per chunk

    need_mask = (pad_cols != 0) or (P * G * r_blk != R_total)

    if P * G == n_tiles:
        def in_map(p, g):
            return (0, p * G + g, 0)
    else:
        # Clamp over-hanging tiles onto the last real block; their
        # contribution is zeroed by the in-kernel mask.
        def in_map(p, g):
            return (0, jnp.minimum(p * G + g, n_tiles - 1), 0)

    out_map = lambda p, g: (p, 0, 0)
    part_shape = jax.ShapeDtypeStruct((P, B, _LANES), jnp.float32)

    kernel = functools.partial(_dice_sums_kernel,
                               n_valid=N, need_mask=need_mask)

    inter_p, psum_p, tsum_p = pl.pallas_call(
        kernel,
        out_shape=(part_shape, part_shape, part_shape),
        grid_spec=pltpu.PrefetchScalarGridSpec(
            num_scalar_prefetch=0,
            grid=(P, G),
            in_specs=[
                pl.BlockSpec((B, r_blk, _LANES), in_map),
                pl.BlockSpec((B, r_blk, _LANES), in_map),
            ],
            out_specs=[
                pl.BlockSpec((1, B, _LANES), out_map),
                pl.BlockSpec((1, B, _LANES), out_map),
                pl.BlockSpec((1, B, _LANES), out_map),
            ],
            scratch_shapes=[
                pltpu.VMEM((B, _LANES), jnp.float32),  # intersection partials
                pltpu.VMEM((B, _LANES), jnp.float32),  # probs-sum partials
                pltpu.VMEM((B, _LANES), jnp.float32),  # target-sum partials
            ],
        ),
        compiler_params=pltpu.CompilerParams(
            dimension_semantics=("parallel", "arbitrary"),
            # Fits double-buffered ~2 MiB tiles everywhere; stays below v7x's
            # 64 MiB per-core VMEM and v5e/v6e physical limits.
            vmem_limit_bytes=48 * 1024 * 1024,
        ),
    )(logits3d, targets3d)

    # Tiny epilogue: combine per-chunk lane-wise partials, form dice, average.
    inter = jnp.sum(inter_p, axis=(0, 2))
    psum = jnp.sum(psum_p, axis=(0, 2))
    tsum = jnp.sum(tsum_p, axis=(0, 2))
    dice_score = (2.0 * inter + smooth) / (psum + tsum + smooth)
    return jnp.mean(1.0 - dice_score)


def _dice_loss_ref(logits, targets, smooth=1.0):
    """Pure-JAX reference matching the PyTorch module."""
    B = logits.shape[0]
    probs = jax.nn.sigmoid(logits).reshape(B, -1)
    tgt = targets.reshape(B, -1).astype(jnp.float32)
    intersection = jnp.sum(probs * tgt, axis=1)
    dice_score = (2.0 * intersection + smooth) / (
        jnp.sum(probs, axis=1) + jnp.sum(tgt, axis=1) + smooth)
    return jnp.mean(1.0 - dice_score)


if __name__ == "__main__":
    key = jax.random.PRNGKey(0)
    k1, k2 = jax.random.split(key)
    B, C, H, W = 2, 4, 16, 16
    logits = jax.random.normal(k1, (B, C, H, W), dtype=jnp.float32)
    targets = (jax.random.uniform(k2, (B, C, H, W)) > 0.5).astype(jnp.float32)

    loss = dice_loss(logits, targets, smooth=1.0)
    jax.block_until_ready(loss)

    ref = _dice_loss_ref(logits, targets, smooth=1.0)
    assert jnp.allclose(loss, ref, atol=1e-5, rtol=1e-5), (loss, ref)
    print("KERNEL_OK")
</pallas_src>

<mosaic_0001>
module attributes {stable_mosaic.version = 11 : i64} {
  func.func @_dice_sums_kernel(%arg0: i32, %arg1: i32, %arg2: memref<2x8x128xf32, #tpu.memory_space<vmem>>, %arg3: memref<2x8x128xf32, #tpu.memory_space<vmem>>, %arg4: memref<1x2x128xf32, #tpu.memory_space<vmem>>, %arg5: memref<1x2x128xf32, #tpu.memory_space<vmem>>, %arg6: memref<1x2x128xf32, #tpu.memory_space<vmem>>, %arg7: memref<2x128xf32, #tpu.memory_space<vmem>>, %arg8: memref<2x128xf32, #tpu.memory_space<vmem>>, %arg9: memref<2x128xf32, #tpu.memory_space<vmem>>) attributes {dimension_semantics = [#tpu.dimension_semantics<parallel>, #tpu.dimension_semantics<arbitrary>], iteration_bounds = array<i64: 1, 1>, scalar_prefetch = 0 : i64, scratch_operands = 3 : i64, tpu.core_type = #tpu.core_type<tc>, window_params = [{transform_indices = @transform_0, window_bounds = array<i64: 2, 8, 128>}, {transform_indices = @transform_1, window_bounds = array<i64: 2, 8, 128>}, {transform_indices = @transform_2, window_bounds = array<i64: 1, 2, 128>}, {transform_indices = @transform_3, window_bounds = array<i64: 1, 2, 128>}, {transform_indices = @transform_4, window_bounds = array<i64: 1, 2, 128>}]} {
    %c0_i32 = arith.constant 0 : i32
    %0 = arith.cmpi eq, %arg1, %c0_i32 : i32
    %1 = arith.extui %0 : i1 to i32
    %c0_i32_0 = arith.constant 0 : i32
    %2 = arith.cmpi ne, %1, %c0_i32_0 : i32
    scf.if %2 {
      %cst_23 = arith.constant 0.000000e+00 : f32
      %26 = vector.broadcast %cst_23 : f32 to vector<2x128xf32>
      %c0_24 = arith.constant 0 : index
      %c0_25 = arith.constant 0 : index
      %27 = vector.load %arg7[%c0_24, %c0_25] : memref<2x128xf32, #tpu.memory_space<vmem>>, vector<2x128xf32>
      tpu.vector_store %arg7[%c0_24, %c0_25], %26 {strides = array<i32>} : memref<2x128xf32, #tpu.memory_space<vmem>>, vector<2x128xf32>,
      %cst_26 = arith.constant 0.000000e+00 : f32
      %28 = vector.broadcast %cst_26 : f32 to vector<2x128xf32>
      %c0_27 = arith.constant 0 : index
      %c0_28 = arith.constant 0 : index
      %29 = vector.load %arg8[%c0_27, %c0_28] : memref<2x128xf32, #tpu.memory_space<vmem>>, vector<2x128xf32>
      tpu.vector_store %arg8[%c0_27, %c0_28], %28 {strides = array<i32>} : memref<2x128xf32, #tpu.memory_space<vmem>>, vector<2x128xf32>,
      %cst_29 = arith.constant 0.000000e+00 : f32
      %30 = vector.broadcast %cst_29 : f32 to vector<2x128xf32>
      %c0_30 = arith.constant 0 : index
      %c0_31 = arith.constant 0 : index
      %31 = vector.load %arg9[%c0_30, %c0_31] : memref<2x128xf32, #tpu.memory_space<vmem>>, vector<2x128xf32>
      tpu.vector_store %arg9[%c0_30, %c0_31], %30 {strides = array<i32>} : memref<2x128xf32, #tpu.memory_space<vmem>>, vector<2x128xf32>,
    } else {
    }
    %c0 = arith.constant 0 : index
    %c0_1 = arith.constant 0 : index
    %c0_2 = arith.constant 0 : index
    %3 = vector.load %arg2[%c0, %c0_1, %c0_2] : memref<2x8x128xf32, #tpu.memory_space<vmem>>, vector<2x8x128xf32>
    %4 = arith.negf %3 : vector<2x8x128xf32>
    %5 = math.exp %4 : vector<2x8x128xf32>
    %cst = arith.constant 1.000000e+00 : f32
    %6 = vector.broadcast %cst : f32 to vector<2x8x128xf32>
    %7 = arith.addf %6, %5 : vector<2x8x128xf32>
    %8 = arith.divf %6, %7 : vector<2x8x128xf32>
    %c0_3 = arith.constant 0 : index
    %c0_4 = arith.constant 0 : index
    %c0_5 = arith.constant 0 : index
    %9 = vector.load %arg3[%c0_3, %c0_4, %c0_5] : memref<2x8x128xf32, #tpu.memory_space<vmem>>, vector<2x8x128xf32>
    %c0_6 = arith.constant 0 : index
    %c0_7 = arith.constant 0 : index
    %10 = vector.load %arg7[%c0_6, %c0_7] : memref<2x128xf32, #tpu.memory_space<vmem>>, vector<2x128xf32>
    %11 = arith.mulf %8, %9 : vector<2x8x128xf32>
    %cst_8 = arith.constant dense<0.000000e+00> : vector<2x128xf32>
    %12 = vector.multi_reduction <add>, %11, %cst_8 [1] : vector<2x8x128xf32> to vector<2x128xf32>
    %13 = arith.addf %10, %12 : vector<2x128xf32>
    %c0_9 = arith.constant 0 : index
    %c0_10 = arith.constant 0 : index
    %14 = vector.load %arg7[%c0_9, %c0_10] : memref<2x128xf32, #tpu.memory_space<vmem>>, vector<2x128xf32>
    tpu.vector_store %arg7[%c0_9, %c0_10], %13 {strides = array<i32>} : memref<2x128xf32, #tpu.memory_space<vmem>>, vector<2x128xf32>,
    %c0_11 = arith.constant 0 : index
    %c0_12 = arith.constant 0 : index
    %15 = vector.load %arg8[%c0_11, %c0_12] : memref<2x128xf32, #tpu.memory_space<vmem>>, vector<2x128xf32>
    %cst_13 = arith.constant dense<0.000000e+00> : vector<2x128xf32>
    %16 = vector.multi_reduction <add>, %8, %cst_13 [1] : vector<2x8x128xf32> to vector<2x128xf32>
    %17 = arith.addf %15, %16 : vector<2x128xf32>
    %c0_14 = arith.constant 0 : index
    %c0_15 = arith.constant 0 : index
    %18 = vector.load %arg8[%c0_14, %c0_15] : memref<2x128xf32, #tpu.memory_space<vmem>>, vector<2x128xf32>
    tpu.vector_store %arg8[%c0_14, %c0_15], %17 {strides = array<i32>} : memref<2x128xf32, #tpu.memory_space<vmem>>, vector<2x128xf32>,
    %c0_16 = arith.constant 0 : index
    %c0_17 = arith.constant 0 : index
    %19 = vector.load %arg9[%c0_16, %c0_17] : memref<2x128xf32, #tpu.memory_space<vmem>>, vector<2x128xf32>
    %cst_18 = arith.constant dense<0.000000e+00> : vector<2x128xf32>
    %20 = vector.multi_reduction <add>, %9, %cst_18 [1] : vector<2x8x128xf32> to vector<2x128xf32>
    %21 = arith.addf %19, %20 : vector<2x128xf32>
    %c0_19 = arith.constant 0 : index
    %c0_20 = arith.constant 0 : index
    %22 = vector.load %arg9[%c0_19, %c0_20] : memref<2x128xf32, #tpu.memory_space<vmem>>, vector<2x128xf32>
    tpu.vector_store %arg9[%c0_19, %c0_20], %21 {strides = array<i32>} : memref<2x128xf32, #tpu.memory_space<vmem>>, vector<2x128xf32>,
    %c0_i32_21 = arith.constant 0 : i32
    %23 = arith.cmpi eq, %arg1, %c0_i32_21 : i32
    %24 = arith.extui %23 : i1 to i32
    %c0_i32_22 = arith.constant 0 : i32
    %25 = arith.cmpi ne, %24, %c0_i32_22 : i32
    scf.if %25 {
      %c0_23 = arith.constant 0 : index
      %c0_24 = arith.constant 0 : index
      %26 = vector.load %arg7[%c0_23, %c0_24] : memref<2x128xf32, #tpu.memory_space<vmem>>, vector<2x128xf32>
      %c0_25 = arith.constant 0 : index
      %c0_26 = arith.constant 0 : index
      %c0_27 = arith.constant 0 : index
      %27 = vector.load %arg4[%c0_25, %c0_26, %c0_27] : memref<1x2x128xf32, #tpu.memory_space<vmem>>, vector<1x2x128xf32>
      %28 = vector.shape_cast %27 : vector<1x2x128xf32> to vector<2x128xf32>
      %29 = vector.shape_cast %26 : vector<2x128xf32> to vector<1x2x128xf32>
      tpu.vector_store %arg4[%c0_25, %c0_26, %c0_27], %29 {strides = array<i32>} : memref<1x2x128xf32, #tpu.memory_space<vmem>>, vector<1x2x128xf32>,
      %c0_28 = arith.constant 0 : index
      %c0_29 = arith.constant 0 : index
      %30 = vector.load %arg8[%c0_28, %c0_29] : memref<2x128xf32, #tpu.memory_space<vmem>>, vector<2x128xf32>
      %c0_30 = arith.constant 0 : index
      %c0_31 = arith.constant 0 : index
      %c0_32 = arith.constant 0 : index
      %31 = vector.load %arg5[%c0_30, %c0_31, %c0_32] : memref<1x2x128xf32, #tpu.memory_space<vmem>>, vector<1x2x128xf32>
      %32 = vector.shape_cast %31 : vector<1x2x128xf32> to vector<2x128xf32>
      %33 = vector.shape_cast %30 : vector<2x128xf32> to vector<1x2x128xf32>
      tpu.vector_store %arg5[%c0_30, %c0_31, %c0_32], %33 {strides = array<i32>} : memref<1x2x128xf32, #tpu.memory_space<vmem>>, vector<1x2x128xf32>,
      %c0_33 = arith.constant 0 : index
      %c0_34 = arith.constant 0 : index
      %34 = vector.load %arg9[%c0_33, %c0_34] : memref<2x128xf32, #tpu.memory_space<vmem>>, vector<2x128xf32>
      %c0_35 = arith.constant 0 : index
      %c0_36 = arith.constant 0 : index
      %c0_37 = arith.constant 0 : index
      %35 = vector.load %arg6[%c0_35, %c0_36, %c0_37] : memref<1x2x128xf32, #tpu.memory_space<vmem>>, vector<1x2x128xf32>
      %36 = vector.shape_cast %35 : vector<1x2x128xf32> to vector<2x128xf32>
      %37 = vector.shape_cast %34 : vector<2x128xf32> to vector<1x2x128xf32>
      tpu.vector_store %arg6[%c0_35, %c0_36, %c0_37], %37 {strides = array<i32>} : memref<1x2x128xf32, #tpu.memory_space<vmem>>, vector<1x2x128xf32>,
    } else {
    }
    return
  }
  func.func @transform_0(%arg0: i32, %arg1: i32) -> (i32, i32, i32) {
    %c1_i32 = arith.constant 1 : i32
    %0 = arith.muli %arg0, %c1_i32 : i32
    %1 = arith.addi %0, %arg1 : i32
    %c0_i32 = arith.constant 0 : i32
    %c0_i32_0 = arith.constant 0 : i32
    %c0_i32_1 = arith.constant 0 : i32
    return %c0_i32, %1, %c0_i32_0 : i32, i32, i32
  }
  func.func @transform_1(%arg0: i32, %arg1: i32) -> (i32, i32, i32) {
    %c1_i32 = arith.constant 1 : i32
    %0 = arith.muli %arg0, %c1_i32 : i32
    %1 = arith.addi %0, %arg1 : i32
    %c0_i32 = arith.constant 0 : i32
    %c0_i32_0 = arith.constant 0 : i32
    %c0_i32_1 = arith.constant 0 : i32
    return %c0_i32, %1, %c0_i32_0 : i32, i32, i32
  }
  func.func @transform_2(%arg0: i32, %arg1: i32) -> (i32, i32, i32) {
    %c0_i32 = arith.constant 0 : i32
    %c0_i32_0 = arith.constant 0 : i32
    %c0_i32_1 = arith.constant 0 : i32
    return %arg0, %c0_i32, %c0_i32_0 : i32, i32, i32
  }
  func.func @transform_3(%arg0: i32, %arg1: i32) -> (i32, i32, i32) {
    %c0_i32 = arith.constant 0 : i32
    %c0_i32_0 = arith.constant 0 : i32
    %c0_i32_1 = arith.constant 0 : i32
    return %arg0, %c0_i32, %c0_i32_0 : i32, i32, i32
  }
  func.func @transform_4(%arg0: i32, %arg1: i32) -> (i32, i32, i32) {
    %c0_i32 = arith.constant 0 : i32
    %c0_i32_0 = arith.constant 0 : i32
    %c0_i32_1 = arith.constant 0 : i32
    return %arg0, %c0_i32, %c0_i32_0 : i32, i32, i32
  }
}

</mosaic_0001>

<bundles_post_ra>
// kernel: tpu_custom_call.1
= control target key start
LH: loop header
LB: loop body
LE: loop exit
PB: predicated region body
PF: predicated region fallthrough
CT: control target
= control target key end

     0   :  { %10 = vsyncpa [#allocation6], 0  ;;  %s433_s0 = inlined_call_operand.hbm [shape: f32[2,8,128], index: 0, kind: input, shape index: {}]   ;;  %s434_s1 = inlined_call_operand.hbm [shape: f32[2,8,128], index: 1, kind: input, shape index: {}]   ;;  %s435_s2 = inlined_call_operand.hbm [shape: f32[1,2,128], index: 2, kind: output, shape index: {0}]   ;;  %s436_s3 = inlined_call_operand.hbm [shape: f32[1,2,128], index: 3, kind: output, shape index: {1}]   ;;  %s437_s4 = inlined_call_operand.hbm [shape: f32[1,2,128], index: 4, kind: output, shape index: {2}]  }
   0x1   :  { %11 = vsyncpa [#allocation9], 0 }
   0x2   :  { %12 = vsyncpa [#allocation7], 0 }
   0x3   :  { %13 = vsyncpa [#allocation12], 0  ;;  %s323_s15 = smov [#allocation5]   ;;  %s205_s19 = scalar_lea.hbm %s433_s0, 256 }
   0x4   :  { %s22_s16 = sshll.u32 %s323_s15, 4  ;;  %p206_p0 = scmp.ne.s32.totalorder %s433_s0, %s205_s19  ;;  %s23_s16 = int_to_ptr.vmem [resolvable:$true] %s22_s16 }
   0x5   :  { %p209_p1 = scmp.lt.u32.totalorder %s205_s19, %s433_s0 }
   0x7   :  { %p211_p2 = pnand %p209_p1, %p206_p0 }
   0x9   :  { %214 = shalt.err (!%p211_p2)
}
   0xa   :  { %s215_s24 = scalar_lea.vmem %s23_s16, 256  ;;  %p220_p4 = scmp.lt.s32.totalorder %s23_s16, %s23_s16 }
   0xb   :  { %p216_p3 = scmp.ne.s32.totalorder %s23_s16, %s215_s24  ;;  %p221_p5 = scmp.lt.s32.totalorder %s215_s24, %s215_s24 }
   0xd   :  { %p222_p6 = por %p221_p5, %p220_p4 }
   0xf   :  { %p223_p7 = pnand %p222_p6, %p216_p3 }
  0x11   :  { %226 = shalt.err (!%p223_p7)
}
  0x12   :  { %s324_s25 = smov 128   ;;  %s325_s26 = smov 8  }
  0x13   :  { %28 = dma.hbm_to_vmem [thread:$0]  %s433_s0, 256, %s23_s16, [#allocation6], %s324_s25, %s324_s25, %s325_s26  }
  0x14   :  { %s326_s29 = smov [#allocation8]   ;;  %s227_s7 = scalar_lea.hbm %s434_s1, 256 }
  0x15   :  { %s37_s30 = sshll.u32 %s326_s29, 4  ;;  %p228_p8 = scmp.ne.s32.totalorder %s434_s1, %s227_s7  ;;  %s38_s30 = int_to_ptr.vmem [resolvable:$true] %s37_s30 }
  0x16   :  { %p231_p9 = scmp.lt.u32.totalorder %s227_s7, %s434_s1 }
  0x18   :  { %p233_p10 = pnand %p231_p9, %p228_p8 }
  0x1a   :  { %236 = shalt.err (!%p233_p10)
}
  0x1b   :  { %s237_s12 = scalar_lea.vmem %s38_s30, 256  ;;  %p242_p12 = scmp.lt.s32.totalorder %s38_s30, %s38_s30 }
  0x1c   :  { %p238_p11 = scmp.ne.s32.totalorder %s38_s30, %s237_s12  ;;  %p243_p13 = scmp.lt.s32.totalorder %s237_s12, %s237_s12 }
  0x1e   :  { %p244_p0 = por %p243_p13, %p242_p12 }
  0x20   :  { %p245_p1 = pnand %p244_p0, %p238_p11 }
  0x22   :  { %248 = shalt.err (!%p245_p1)
}
  0x23   :  { %43 = dma.hbm_to_vmem [thread:$0]  %s434_s1, 256, %s38_s30, [#allocation9], %s324_s25, %s324_s25, %s325_s26  }
  0x24   :  { %315 = dma.done.wait [#allocation6], 256  }
  0x25   :  { %316 = vsyncadd [#allocation6], 4294967040 }
  0x26   :  { %317 = dma.done.wait [#allocation9], 256  }
  0x27   :  { %318 = vsyncadd [#allocation9], 4294967040  ;;  %v327_v0 = vmov 0.0   ;;  %v59_v1 = vld [vmem:[#allocation5] sm:$0xff]  ;;  %v60_v2 = vld [vmem:[#allocation5 + $0x8] sm:$0xff]  ;;  %vm92_vm0 = vcmask 1041409  }
  0x28   :  { %57 = vst [vmem:[#allocation3] sm:$0x3] %v327_v0  ;;  %56 = vst [vmem:[#allocation2] sm:$0x3] %v327_v0  ;;  %v187_v3 = vmul.f32 -1.442695, %v59_v1 }
  0x29   :  { %58 = vst [vmem:[#allocation4] sm:$0x3] %v327_v0  ;;  %v188_v4 = vmul.f32 -1.442695, %v60_v2  ;;  %v73_v5 = vld [vmem:[#allocation8] sm:$0xff]  ;;  %v74_v6 = vld [vmem:[#allocation8 + $0x8] sm:$0xff] }
  0x2a   :  { %v117_v7 = vrot.slane %v73_v5, 4  ;;  %197 = vpow2.f32 %v187_v3  ;;  %v123_v8 = vrot.slane %v74_v6, 4  ;;  %s328_s1 = smov [#allocation11]   ;;  %s329_s15 = smov [#allocation13]  }
  0x2b   :  { %199 = vpow2.f32 %v188_v4  ;;  %s160_s14 = sshll.u32 %s328_s1, 4  ;;  %s170_s16 = sshll.u32 %s329_s15, 4  ;;  %s161_s14 = int_to_ptr.vmem [resolvable:$true] %s160_s14  ;;  %s383_s16 = int_to_ptr.vmem [resolvable:$true] %s170_s16 }
  0x2c   :  { %v118_v9 = vadd.f32 %v117_v7, %v73_v5  ;;  %v124_v10 = vadd.f32 %v123_v8, %v74_v6  ;;  %s330_s17 = smov [#allocation10]   ;;  %s249_s19 = scalar_lea.vmem %s161_s14, 32 }
  0x2d   :  { %s150_s18 = sshll.u32 %s330_s17, 4  ;;  %p250_p2 = scmp.ne.s32.totalorder %s161_s14, %s249_s19  ;;  %s385_s18 = int_to_ptr.vmem [resolvable:$true] %s150_s18 }
  0x2e   :  { %v119_v11 = vrot.slane %v118_v9, 2  ;;  %v125_v12 = vrot.slane %v124_v10, 2  ;;  %p254_p3 = scmp.lt.s32.totalorder %s161_s14, %s161_s14  ;;  %p255_p4 = scmp.lt.s32.totalorder %s249_s19, %s249_s19 }
  0x2f   :  { %v97_v51 = vld [vmem:[#allocation3] sm:$0x3]  ;;  %v75_v56 = vld [vmem:[#allocation2] sm:$0x3] }
  0x30   :  { %v120_v13 = vadd.f32 %v119_v11, %v118_v9  ;;  %v126_v14 = vadd.f32 %v125_v12, %v124_v10  ;;  %v116_v19 = vld [vmem:[#allocation4] sm:$0x3]  ;;  %p256_p5 = por %p255_p4, %p254_p3 }
  0x32   :  { %v121_v15 = vrot.slane %v120_v13, 1  ;;  %v127_v16 = vrot.slane %v126_v14, 1  ;;  %p257_p6 = pnand %p256_p5, %p250_p2 }
  0x34   :  { %v122_v17 = vadd.f32 %v121_v15, %v120_v13  ;;  %v198_v18 = vpop.eup %197  ;;  %v128_v20 = vadd.f32 %v127_v16, %v126_v14 }
  0x35   :  { %v200_v21 = vpop.eup %199  ;;  %v67_v22 = vadd.f32 1.0, %v198_v18 }
  0x36   :  { %v68_v23 = vadd.f32 1.0, %v200_v21  ;;  %v131_v24 = vsel %vm92_vm0, %v128_v20, %v122_v17 }
  0x37   :  { %201 = vrcp.f32 %v67_v22  ;;  %v133_v25 = vadd.f32 %v131_v24, %v116_v19 }
  0x38   :  { %203 = vrcp.f32 %v68_v23 }
  0x39   :  { %134 = vst [vmem:[#allocation4] sm:$0x3] %v133_v25 }
  0x40   :  { %v142_v26 = vld [vmem:[#allocation4] sm:$0x3] }
  0x41   :  { %v202_v27 = vpop.eup %201  ;;  %143 = vst [vmem:[#allocation13] sm:$0x3] %v142_v26 }
  0x42   :  { %v204_v28 = vpop.eup %203  ;;  %v98_v29 = vrot.slane %v202_v27, 4  ;;  %v76_v30 = vmul.f32 %v202_v27, %v73_v5 }
  0x43   :  { %v104_v31 = vrot.slane %v204_v28, 4  ;;  %v77_v32 = vmul.f32 %v204_v28, %v74_v6 }
  0x44   :  { %v99_v33 = vadd.f32 %v202_v27, %v98_v29  ;;  %v78_v34 = vrot.slane %v76_v30, 4 }
  0x45   :  { %v105_v35 = vadd.f32 %v204_v28, %v104_v31  ;;  %v84_v36 = vrot.slane %v77_v32, 4 }
  0x46   :  { %v100_v37 = vrot.slane %v99_v33, 2  ;;  %v79_v38 = vadd.f32 %v78_v34, %v76_v30 }
  0x47   :  { %v106_v39 = vrot.slane %v105_v35, 2  ;;  %v85_v40 = vadd.f32 %v84_v36, %v77_v32 }
  0x48   :  { %v101_v41 = vadd.f32 %v100_v37, %v99_v33  ;;  %v80_v42 = vrot.slane %v79_v38, 2 }
  0x49   :  { %v107_v43 = vadd.f32 %v106_v39, %v105_v35  ;;  %v86_v44 = vrot.slane %v85_v40, 2 }
  0x4a   :  { %v102_v45 = vrot.slane %v101_v41, 1  ;;  %v81_v46 = vadd.f32 %v80_v42, %v79_v38 }
  0x4b   :  { %v108_v47 = vrot.slane %v107_v43, 1  ;;  %v87_v48 = vadd.f32 %v86_v44, %v85_v40 }
  0x4c   :  { %v103_v49 = vadd.f32 %v102_v45, %v101_v41  ;;  %v82_v50 = vrot.slane %v81_v46, 1 }
  0x4d   :  { %v109_v52 = vadd.f32 %v108_v47, %v107_v43  ;;  %v88_v53 = vrot.slane %v87_v48, 1 }
  0x4e   :  { %v83_v54 = vadd.f32 %v82_v50, %v81_v46 }
  0x4f   :  { %v112_v55 = vsel %vm92_vm0, %v109_v52, %v103_v49  ;;  %v89_v57 = vadd.f32 %v88_v53, %v87_v48 }
  0x50   :  { %v114_v58 = vadd.f32 %v112_v55, %v97_v51 }
  0x51   :  { %v93_v59 = vsel %vm92_vm0, %v89_v57, %v83_v54 }
  0x52   :  { %115 = vst [vmem:[#allocation3] sm:$0x3] %v114_v58  ;;  %v95_v60 = vadd.f32 %v93_v59, %v75_v56 }
  0x54   :  { %96 = vst [vmem:[#allocation2] sm:$0x3] %v95_v60 }
  0x59   :  { %v140_v61 = vld [vmem:[#allocation3] sm:$0x3] }
  0x5a   :  { %141 = vst [vmem:[#allocation11] sm:$0x3] %v140_v61 }
  0x5b   :  { %v138_v62 = vld [vmem:[#allocation2] sm:$0x3] }
  0x5c   :  { %260 = shalt.err (!%p257_p6)
}
  0x5d   :  { %s261_s22 = scalar_lea.hbm %s436_s3, 32 }
  0x5e   :  { %p262_p7 = scmp.ne.s32.totalorder %s436_s3, %s261_s22  ;;  %p265_p8 = scmp.lt.u32.totalorder %s261_s22, %s436_s3 }
  0x60   :  { %p267_p9 = pnand %p265_p8, %p262_p7 }
  0x62   :  { %270 = shalt.err (!%p267_p9)
}
  0x63   :  { %163 = dma.vmem_to_hbm [thread:$0]  %s161_s14, 32, %s436_s3, [#allocation12]   ;;  %139 = vst [vmem:[#allocation10] sm:$0x3] %v138_v62 }
  0x64   :  { %s271_s29 = scalar_lea.vmem %s383_s16, 32  ;;  %p276_p11 = scmp.lt.s32.totalorder %s383_s16, %s383_s16 }
  0x65   :  { %p272_p10 = scmp.ne.s32.totalorder %s383_s16, %s271_s29  ;;  %p277_p12 = scmp.lt.s32.totalorder %s271_s29, %s271_s29 }
  0x67   :  { %p278_p13 = por %p277_p12, %p276_p11 }
  0x69   :  { %p279_p0 = pnand %p278_p13, %p272_p10 }
  0x6b   :  { %282 = shalt.err (!%p279_p0)
}
  0x6c   :  { %s283_s6 = scalar_lea.hbm %s437_s4, 32 }
  0x6d   :  { %p284_p1 = scmp.ne.s32.totalorder %s437_s4, %s283_s6  ;;  %p287_p2 = scmp.lt.u32.totalorder %s283_s6, %s437_s4 }
  0x6f   :  { %p289_p3 = pnand %p287_p2, %p284_p1 }
  0x71   :  { %292 = shalt.err (!%p289_p3)
}
  0x72   :  { %173 = dma.vmem_to_hbm [thread:$0]  %s383_s16, 32, %s437_s4, [#allocation12]  }
  0x73   :  { %s293_s12 = scalar_lea.vmem %s385_s18, 32  ;;  %p298_p5 = scmp.lt.s32.totalorder %s385_s18, %s385_s18 }
  0x74   :  { %p294_p4 = scmp.ne.s32.totalorder %s385_s18, %s293_s12  ;;  %p299_p6 = scmp.lt.s32.totalorder %s293_s12, %s293_s12 }
  0x76   :  { %p300_p7 = por %p299_p6, %p298_p5 }
  0x78   :  { %p301_p8 = pnand %p300_p7, %p294_p4 }
  0x7a   :  { %304 = shalt.err (!%p301_p8)
}
  0x7b   :  { %s305_s1 = scalar_lea.hbm %s435_s2, 32 }
  0x7c   :  { %p306_p9 = scmp.ne.s32.totalorder %s435_s2, %s305_s1  ;;  %p309_p10 = scmp.lt.u32.totalorder %s305_s1, %s435_s2 }
  0x7e   :  { %p311_p11 = pnand %p309_p10, %p306_p9 }
  0x80   :  { %314 = shalt.err (!%p311_p11)
}
  0x81   :  { %153 = dma.vmem_to_hbm [thread:$0]  %s385_s18, 32, %s435_s2, [#allocation7]  }
  0x82   :  { %319 = dma.done.wait [#allocation7], 32  }
  0x83   :  { %320 = vsyncadd [#allocation7], 4294967264 }
  0x84   :  { %321 = dma.done.wait [#allocation12], 64  }
  0x85   :  { %322 = vsyncadd [#allocation12], 4294967232 }
  0x86   :  { %183 = vsyncpa [#allocation6], 1 }
  0x87   :  { %184 = vsyncpa [#allocation9], 1 }
  0x88   :  { %185 = vsyncpa [#allocation7], 1 }
  0x89   :  { %186 = vsyncpa [#allocation12], 1 }

</bundles_post_ra>
